<compile_context>
chip_gen: v6e
topology: v6e:2x2x1
jax: 0.10.0
libtpu: 0.0.40
codegen_flags: <defaults>
</compile_context>

<pallas_src>
from functools import partial

import numpy as np
import jax
import jax.numpy as jnp
from jax.experimental import pallas as pl
from jax.experimental.pallas import tpu as pltpu


# ----------------------------------------------------------------------------
# Rs bookkeeping (ports of e3nn/rs.py helpers, numpy/python only)
# ----------------------------------------------------------------------------
def convention(Rs):
    out = []
    for r in Rs:
        if isinstance(r, int):
            mul, l, p = 1, r, 0
        elif len(r) == 2:
            (mul, l), p = r, 0
        else:
            mul, l, p = r
        assert isinstance(mul, int) and mul >= 0
        assert isinstance(l, int) and l >= 0
        assert p in [0, 1, -1]
        out.append((mul, l, p))
    return out


def dim(Rs):
    Rs = convention(Rs)
    return sum(mul * (2 * l + 1) for mul, l, _ in Rs)


def simplify(Rs):
    out = []
    for mul, l, p in convention(Rs):
        if out and out[-1][1:] == (l, p):
            out[-1] = (out[-1][0] + mul, l, p)
        elif mul > 0:
            out.append((mul, l, p))
    return out


def sort_Rs(Rs):
    """Stable sort by (l, p); returns (Rs_sorted, row-permutation index array)
    such that sorted_rows = unsorted_rows[perm]."""
    Rs_in = simplify(Rs)
    xs = []
    j = 0
    for mul, l, p in Rs_in:
        d = mul * (2 * l + 1)
        xs.append((l, p, mul, j, d))
        j += d
    Rs_out = []
    perm = []
    for l, p, mul, j, d in sorted(xs):
        Rs_out.append((mul, l, p))
        perm.extend(range(j, j + d))
    return Rs_out, np.asarray(perm, dtype=np.int64)


# ----------------------------------------------------------------------------
# Wigner 3j in the real spherical-harmonics basis (l <= 1, exact closed forms)
# ----------------------------------------------------------------------------
def wigner_3j_real(l1, l2, l3):
    key = (l1, l2, l3)
    if key == (0, 0, 0):
        return np.ones((1, 1, 1))
    if key == (1, 1, 0):
        return (np.eye(3) / np.sqrt(3.0)).reshape(3, 3, 1)
    if key == (1, 0, 1):
        C = np.zeros((3, 1, 3))
        for i in range(3):
            C[i, 0, i] = 1.0 / np.sqrt(3.0)
        return C
    if key == (0, 1, 1):
        return (np.eye(3) / np.sqrt(3.0)).reshape(1, 3, 3)
    if key == (1, 1, 1):
        eps = np.zeros((3, 3, 3))
        eps[0, 1, 2] = eps[1, 2, 0] = eps[2, 0, 1] = 1.0
        eps[0, 2, 1] = eps[2, 1, 0] = eps[1, 0, 2] = -1.0
        return eps / np.sqrt(6.0)
    # TODO(synk): higher-l Wigner 3j (needs real-basis change-of-basis machinery)
    raise NotImplementedError(f"wigner_3j for {key} not implemented (l<=1 only)")


def selection_rule(l1, p1, l2, p2, lmax=1):
    return [l for l in range(abs(l1 - l2), l1 + l2 + 1) if l <= lmax]


# ----------------------------------------------------------------------------
# Mixing-matrix construction (dense port of _tensor_product_in_in)
# ----------------------------------------------------------------------------
def tensor_product_in_in_dense(Rs_in1, Rs_in2, sel, normalization="component",
                               sorted_=True):
    assert normalization in ("norm", "component")
    Rs_in1 = simplify(Rs_in1)
    Rs_in2 = simplify(Rs_in2)

    Rs_out = []
    for mul1, l1, p1 in Rs_in1:
        for mul2, l2, p2 in Rs_in2:
            for lo in sel(l1, p1, l2, p2):
                Rs_out.append((mul1 * mul2, lo, p1 * p2))
    Rs_out = simplify(Rs_out)

    d1, d2, do = dim(Rs_in1), dim(Rs_in2), dim(Rs_out)
    Q = np.zeros((do, d1, d2), dtype=np.float64)

    index_out = 0
    index_1 = 0
    for mul1, l1, p1 in Rs_in1:
        dim_1 = mul1 * (2 * l1 + 1)
        index_2 = 0
        for mul2, l2, p2 in Rs_in2:
            dim_2 = mul2 * (2 * l2 + 1)
            for lo in sel(l1, p1, l2, p2):
                dim_o = mul1 * mul2 * (2 * lo + 1)
                C = wigner_3j_real(lo, l1, l2).copy()
                if normalization == "component":
                    C *= (2 * lo + 1) ** 0.5
                if normalization == "norm":
                    C *= ((2 * l1 + 1) * (2 * l2 + 1)) ** 0.5
                I = np.eye(mul1 * mul2).reshape(mul1 * mul2, mul1, mul2)
                m = np.einsum("wuv,kij->wkuivj", I, C).reshape(dim_o, dim_1, dim_2)
                Q[index_out:index_out + dim_o,
                  index_1:index_1 + dim_1,
                  index_2:index_2 + dim_2] = m
                index_out += dim_o
            index_2 += dim_2
        index_1 += dim_1

    if sorted_:
        Rs_out, perm = sort_Rs(Rs_out)
        Rs_out = simplify(Rs_out)
        Q = Q[perm]
    return Rs_out, Q


# ----------------------------------------------------------------------------
# Pallas kernel
#   h[z, j*DP + k] = sum_i f1[z, i] * Q[k, i, j]        (one MXU matmul)
#   out[z, k]      = sum_j f2[z, j] * h[z, j*DP + k]    (d_in2 VPU FMAs)
# ----------------------------------------------------------------------------
def _tp_kernel(f1_ref, f2_ref, qa_ref, o_ref, *, d_in2, d_out, dp):
    f1 = f1_ref[...].astype(jnp.float32)          # (TB, d_in1)
    f2 = f2_ref[...].astype(jnp.float32)          # (TB, d_in2)
    qa = qa_ref[...]                              # (d_in1, d_in2 * dp), f32

    # Single MXU matmul, f32 accumulation.
    h = jnp.dot(f1, qa, preferred_element_type=jnp.float32)   # (TB, d_in2*dp)

    # d_in2 FMAs over 128-lane-aligned slices of h (dp is a multiple of 128).
    acc = f2[:, 0:1] * h[:, 0:dp]
    for j in range(1, d_in2):
        acc = acc + f2[:, j:j + 1] * h[:, j * dp:(j + 1) * dp]

    o_ref[...] = acc[:, :d_out].astype(o_ref.dtype)


def tensor_product_forward(features_1, features_2, Q, *, tile_b=512,
                           input_dtype=jnp.bfloat16):
    """features_1: [..., d_in1], features_2: [..., d_in2],
    Q: (d_out, d_in1, d_in2) mixing matrix.  Returns [..., d_out] (float32)."""
    d_out, d_in1, d_in2 = Q.shape
    size = features_1.shape[:-1]
    assert features_2.shape[:-1] == size

    # bf16 inputs halve HBM read traffic; all in-kernel math stays f32.
    f1 = features_1.reshape(-1, d_in1).astype(input_dtype)
    f2 = features_2.reshape(-1, d_in2).astype(input_dtype)
    B = f1.shape[0]

    # Flattened, lane-padded mixing matrix: QA[i, j*DP + k] = Q[k, i, j].
    DP = ((d_out + 127) // 128) * 128
    QA = np.zeros((d_in1, d_in2, DP), dtype=np.float32)
    QA[:, :, :d_out] = np.transpose(np.asarray(Q, dtype=np.float32), (1, 2, 0))
    QA = jnp.asarray(QA.reshape(d_in1, d_in2 * DP))

    # Batch tiling: large tile (sweep 512/1024/2048), but never bigger than the
    # (sublane-rounded) batch itself; pad the batch instead of asserting.
    # TODO(synk): for v7x, cap TB so the grid has >= 2 parallel steps when B is
    # large enough to feed both TensorCores.
    TB = int(min(tile_b, max(8, -(-B // 8) * 8)))
    Bp = -(-B // TB) * TB
    if Bp != B:
        f1 = jnp.pad(f1, ((0, Bp - B), (0, 0)))
        f2 = jnp.pad(f2, ((0, Bp - B), (0, 0)))

    out = pl.pallas_call(
        partial(_tp_kernel, d_in2=d_in2, d_out=d_out, dp=DP),
        out_shape=jax.ShapeDtypeStruct((Bp, d_out), jnp.float32),
        grid=(Bp // TB,),
        in_specs=[
            pl.BlockSpec((TB, d_in1), lambda b: (b, 0)),
            pl.BlockSpec((TB, d_in2), lambda b: (b, 0)),
            pl.BlockSpec((d_in1, d_in2 * DP), lambda b: (0, 0)),  # resident
        ],
        out_specs=pl.BlockSpec((TB, d_out), lambda b: (b, 0)),
        compiler_params=pltpu.CompilerParams(
            dimension_semantics=("parallel",),
            vmem_limit_bytes=32 * 1024 * 1024),
    )(f1, f2, QA)

    return out[:B].reshape(*size, d_out)


# ----------------------------------------------------------------------------
if __name__ == "__main__":
    # Module config (TensorProduct(Rs_in1, Rs_in2, selection_rule)) -> _complete='out'
    Rs_in1 = [(2, 0), (2, 1)]          # d_in1 = 2 + 6 = 8
    Rs_in2 = [(2, 0), (1, 1)]          # d_in2 = 2 + 3 = 5
    sel = partial(selection_rule, lmax=1)

    Rs_out, Q = tensor_product_in_in_dense(Rs_in1, Rs_in2, sel,
                                           normalization="component",
                                           sorted_=True)
    d_in1, d_in2, d_out = dim(Rs_in1), dim(Rs_in2), dim(Rs_out)
    Q = np.asarray(Q, dtype=np.float32)

    key = jax.random.PRNGKey(0)
    k1, k2 = jax.random.split(key)
    # Small shapes; batch (2, 9) is deliberately NOT a multiple of 8 to
    # exercise the pad-and-slice path that replaced the old assert.
    features_1 = jax.random.normal(k1, (2, 9, d_in1), dtype=jnp.float32)
    features_2 = jax.random.normal(k2, (2, 9, d_in2), dtype=jnp.float32)

    out = tensor_product_forward(features_1, features_2, Q,
                                 tile_b=512, input_dtype=jnp.bfloat16)
    out = jax.block_until_ready(out)

    # Reference for the exact forward semantics, computed from the same
    # bf16-quantized inputs (all contraction math in f32, like the kernel).
    f1_q = features_1.astype(jnp.bfloat16).astype(jnp.float32)
    f2_q = features_2.astype(jnp.bfloat16).astype(jnp.float32)
    ref = jnp.einsum("kij,...i,...j->...k", jnp.asarray(Q), f1_q, f2_q)

    assert out.shape == (2, 9, d_out)
    if not jnp.allclose(out, ref, atol=1e-4, rtol=1e-4):
        err = float(jnp.max(jnp.abs(out - ref)))
        raise AssertionError(f"Pallas kernel output mismatch vs reference (max err {err})")

    print("KERNEL_OK")
</pallas_src>

<mosaic_0001>
module attributes {stable_mosaic.version = 11 : i64} {
  func.func @_tp_kernel(%arg0: i32, %arg1: memref<24x8xbf16, #tpu.memory_space<vmem>>, %arg2: memref<24x5xbf16, #tpu.memory_space<vmem>>, %arg3: memref<8x640xf32, #tpu.memory_space<vmem>>, %arg4: memref<24x30xf32, #tpu.memory_space<vmem>>) attributes {dimension_semantics = [#tpu.dimension_semantics<parallel>], iteration_bounds = array<i64: 1>, scalar_prefetch = 0 : i64, scratch_operands = 0 : i64, tpu.core_type = #tpu.core_type<tc>, window_params = [{transform_indices = @transform_0, window_bounds = array<i64: 24, 8>}, {transform_indices = @transform_1, window_bounds = array<i64: 24, 5>}, {pipeline_mode = #tpu.pipeline_mode<synchronous>, transform_indices = @transform_2, window_bounds = array<i64: 8, 640>}, {transform_indices = @transform_3, window_bounds = array<i64: 24, 30>}]} {
    %c0 = arith.constant 0 : index
    %c0_0 = arith.constant 0 : index
    %0 = vector.load %arg1[%c0, %c0_0] : memref<24x8xbf16, #tpu.memory_space<vmem>>, vector<24x8xbf16>
    %1 = arith.extf %0 : vector<24x8xbf16> to vector<24x8xf32>
    %c0_1 = arith.constant 0 : index
    %c0_2 = arith.constant 0 : index
    %2 = vector.load %arg2[%c0_1, %c0_2] : memref<24x5xbf16, #tpu.memory_space<vmem>>, vector<24x5xbf16>
    %3 = arith.extf %2 : vector<24x5xbf16> to vector<24x5xf32>
    %c0_3 = arith.constant 0 : index
    %c0_4 = arith.constant 0 : index
    %4 = vector.load %arg3[%c0_3, %c0_4] : memref<8x640xf32, #tpu.memory_space<vmem>>, vector<8x640xf32>
    %cst = arith.constant dense<0.000000e+00> : vector<24x640xf32>
    %5 = tpu.matmul %1, %4, %cst {dimension_numbers = #tpu.dot_dimension_numbers<[1], [0], [0], [1], [0, 0, 1, 1], [], []>} : vector<24x8xf32>, vector<8x640xf32>, vector<24x640xf32> -> vector<24x640xf32>
    %6 = vector.extract_strided_slice %3 {offsets = [0, 0], sizes = [24, 1], strides = [1, 1]} : vector<24x5xf32> to vector<24x1xf32>
    %7 = vector.extract_strided_slice %5 {offsets = [0, 0], sizes = [24, 128], strides = [1, 1]} : vector<24x640xf32> to vector<24x128xf32>
    %8 = vector.broadcast %6 : vector<24x1xf32> to vector<24x128xf32>
    %9 = arith.mulf %8, %7 : vector<24x128xf32>
    %10 = vector.extract_strided_slice %3 {offsets = [0, 1], sizes = [24, 1], strides = [1, 1]} : vector<24x5xf32> to vector<24x1xf32>
    %11 = vector.extract_strided_slice %5 {offsets = [0, 128], sizes = [24, 128], strides = [1, 1]} : vector<24x640xf32> to vector<24x128xf32>
    %12 = vector.broadcast %10 : vector<24x1xf32> to vector<24x128xf32>
    %13 = arith.mulf %12, %11 : vector<24x128xf32>
    %14 = arith.addf %9, %13 : vector<24x128xf32>
    %15 = vector.extract_strided_slice %3 {offsets = [0, 2], sizes = [24, 1], strides = [1, 1]} : vector<24x5xf32> to vector<24x1xf32>
    %16 = vector.extract_strided_slice %5 {offsets = [0, 256], sizes = [24, 128], strides = [1, 1]} : vector<24x640xf32> to vector<24x128xf32>
    %17 = vector.broadcast %15 : vector<24x1xf32> to vector<24x128xf32>
    %18 = arith.mulf %17, %16 : vector<24x128xf32>
    %19 = arith.addf %14, %18 : vector<24x128xf32>
    %20 = vector.extract_strided_slice %3 {offsets = [0, 3], sizes = [24, 1], strides = [1, 1]} : vector<24x5xf32> to vector<24x1xf32>
    %21 = vector.extract_strided_slice %5 {offsets = [0, 384], sizes = [24, 128], strides = [1, 1]} : vector<24x640xf32> to vector<24x128xf32>
    %22 = vector.broadcast %20 : vector<24x1xf32> to vector<24x128xf32>
    %23 = arith.mulf %22, %21 : vector<24x128xf32>
    %24 = arith.addf %19, %23 : vector<24x128xf32>
    %25 = vector.extract_strided_slice %3 {offsets = [0, 4], sizes = [24, 1], strides = [1, 1]} : vector<24x5xf32> to vector<24x1xf32>
    %26 = vector.extract_strided_slice %5 {offsets = [0, 512], sizes = [24, 128], strides = [1, 1]} : vector<24x640xf32> to vector<24x128xf32>
    %27 = vector.broadcast %25 : vector<24x1xf32> to vector<24x128xf32>
    %28 = arith.mulf %27, %26 : vector<24x128xf32>
    %29 = arith.addf %24, %28 : vector<24x128xf32>
    %30 = vector.extract_strided_slice %29 {offsets = [0, 0], sizes = [24, 30], strides = [1, 1]} : vector<24x128xf32> to vector<24x30xf32>
    %c0_5 = arith.constant 0 : index
    %c0_6 = arith.constant 0 : index
    %31 = vector.load %arg4[%c0_5, %c0_6] : memref<24x30xf32, #tpu.memory_space<vmem>>, vector<24x30xf32>
    tpu.vector_store %arg4[%c0_5, %c0_6], %30 {strides = array<i32>} : memref<24x30xf32, #tpu.memory_space<vmem>>, vector<24x30xf32>,
    return
  }
  func.func @transform_0(%arg0: i32) -> (i32, i32) {
    %c0_i32 = arith.constant 0 : i32
    %c0_i32_0 = arith.constant 0 : i32
    return %arg0, %c0_i32 : i32, i32
  }
  func.func @transform_1(%arg0: i32) -> (i32, i32) {
    %c0_i32 = arith.constant 0 : i32
    %c0_i32_0 = arith.constant 0 : i32
    return %arg0, %c0_i32 : i32, i32
  }
  func.func @transform_2(%arg0: i32) -> (i32, i32) {
    %c0_i32 = arith.constant 0 : i32
    %c0_i32_0 = arith.constant 0 : i32
    %c0_i32_1 = arith.constant 0 : i32
    return %c0_i32, %c0_i32_0 : i32, i32
  }
  func.func @transform_3(%arg0: i32) -> (i32, i32) {
    %c0_i32 = arith.constant 0 : i32
    %c0_i32_0 = arith.constant 0 : i32
    return %arg0, %c0_i32 : i32, i32
  }
}

</mosaic_0001>

<bundles_post_ra>
// kernel: tpu_custom_call.1
= control target key start
LH: loop header
LB: loop body
LE: loop exit
PB: predicated region body
PF: predicated region fallthrough
CT: control target
= control target key end

     0   :  { %8 = vsyncpa [#allocation3], 0  ;;  %s594_s0 = inlined_call_operand.vmem [shape: bf16[24,8], index: 0, kind: input, shape index: {}]   ;;  %s595_s1 = inlined_call_operand.vmem [shape: bf16[24,5], index: 1, kind: input, shape index: {}]   ;;  %s596_s2 = inlined_call_operand.hbm [shape: f32[8,640], index: 2, kind: input, shape index: {}]   ;;  %s597_s3 = inlined_call_operand.hbm [shape: f32[24,30], index: 3, kind: output, shape index: {}]  }
   0x1   :  { %9 = vsyncpa [#allocation4], 0  ;;  %s533_s12 = smov [#allocation2]  }
   0x2   :  { %s20_s13 = sshll.u32 %s533_s12, 4  ;;  %s21_s13 = int_to_ptr.vmem [resolvable:$true] %s20_s13 }
   0x3   :  { %s497_s14 = scalar_lea.vmem %s21_s13, 640  ;;  %p502_p1 = scmp.lt.s32.totalorder %s21_s13, %s21_s13 }
   0x4   :  { %p498_p0 = scmp.ne.s32.totalorder %s21_s13, %s497_s14  ;;  %p503_p2 = scmp.lt.s32.totalorder %s497_s14, %s497_s14 }
   0x6   :  { %p504_p3 = por %p503_p2, %p502_p1 }
   0x8   :  { %p505_p4 = pnand %p504_p3, %p498_p0 }
   0xa   :  { %508 = shalt.err (!%p505_p4)
}
   0xb   :  { %23 = dma.hbm_to_vmem [thread:$0]  %s596_s2, 640, %s21_s13, [#allocation3]  }
   0xc   :  { %529 = dma.done.wait [#allocation3], 640  }
   0xd   :  { %530 = vsyncadd [#allocation3], 4294966656  ;;  %v534_v0 = vmov 0.0   ;;  %v535_v1 = vmov 1   ;;  %v536_v2 = vmov 0   ;;  %v40_v3 = vld [vmem:[#allocation2 + $0x8] sm:$0xff] }
   0xe   :  { %118 = vmatprep.mubr.f32.mxu0 %v534_v0  ;;  %124 = vmatprep.mubr.f32.mxu1 %v534_v0  ;;  %v39_v4 = vld [vmem:[#allocation2] sm:$0xff]  ;;  %vm44_vm0 = vcmask 64512   ;;  %v42_v8 = vld [vmem:[#allocation2 + $0x18] sm:$0xff]  ;;  %v29_v9 = vld [vmem:[%s594_s0 + $0x8] sm:$0xf]  ;;  %vm537_vm1 = vmmov 0  }
   0xf   :  { %462 = vset.pattern.permute.xlu1 %v535_v1  ;;  %456 = vset.pattern.permute.xlu0 %v536_v2  ;;  %v421_v5 = vld [vmem:[%s594_s0] sm:$0xff]   ;;  %v41_v10 = vld [vmem:[#allocation2 + $0x10] sm:$0xff]  ;;  %v32_v12 = vunpack.c.l.bf16 %v29_v9  ;;  %v35_v17 = vld [vmem:[%s595_s1 + $0x8] sm:$0xf]  ;;  %v538_v19 = vmov 2   ;;  %v539_v20 = vmov 3  }
  0x10   :  { %84 = vmatprep.subr.mxu0 %v40_v3  ;;  %443 = vmatprep.subr.mxu1 %v40_v3  ;;  %v422_v6 = vunpack.c.l.bf16 %v421_v5  ;;  %v423_v7 = vunpack.c.h.bf16 %v421_v5  ;;  %v425_v11 = vld [vmem:[%s595_s1] sm:$0xff]   ;;  %v38_v18 = vunpack.c.l.bf16 %v35_v17  ;;  %v540_v21 = vmov 4   ;;  %s541_s1 = smov [#allocation5]  }
  0x11   :  { %85 = vmatpush1.msra.mxu0 %v39_v4  ;;  %444 = vmatpush1.msra.mxu1 %v39_v4  ;;  %v43_v13 = vld [vmem:[#allocation2 + $0x20] sm:$0xff]  ;;  %v426_v14 = vunpack.c.l.bf16 %v425_v11  ;;  %v427_v15 = vunpack.c.h.bf16 %v425_v11  ;;  %vm390_vm2 = vcmask 244736   ;;  %s399_s23 = sshll.u32 %s541_s1, 4  ;;  %s400_s23 = int_to_ptr.vmem [resolvable:$true] %s399_s23 }
  0x12   :  { %411 = vmatmul.mubr.msk.f32.vlgmr.msra.gmra.mxu0 %vm44_vm0, %v422_v6  ;;  %412 = vmatmul.mubr.msk.f32.vlgmr.msra.gmra.mxu1 %vm44_vm0, %v423_v7  ;;  %s509_s24 = scalar_lea.vmem %s400_s23, 384  ;;  %p514_p6 = scmp.lt.s32.totalorder %s400_s23, %s400_s23 }
  0x13   :  { %167 = vmatprep.subr.mxu1 %v42_v8  ;;  %130 = vmatprep.mubr.f32.mxu1 %v534_v0  ;;  %v463_v16 = vpack.i.bf16 %v427_v15, %v426_v14  ;;  %p510_p5 = scmp.ne.s32.totalorder %s400_s23, %s509_s24  ;;  %p515_p7 = scmp.lt.s32.totalorder %s509_s24, %s509_s24 }
  0x14   :  { %168 = vmatpush1.msra.mxu1 %v41_v10  ;;  %432 = vmatprep.subr.mxu0 %v534_v0 }
  0x15   :  { %433 = vmatpush3.msra.mxu0 %v43_v13  ;;  %434 = vmatprep.mubr.msk.f32.mxu0 %vm537_vm1, %v534_v0  ;;  %p516_p8 = por %p515_p7, %p514_p6 }
  0x16   :  { %413 = vmatmul.mubr.msk.f32.gmra.mxu1 %vm44_vm0, %v32_v12  ;;  %435 = vmatmul.mubr.msk.f32.vlgmr.msra.gmra.mxu0 %vm44_vm0, %v422_v6 }
  0x17   :  { %201 = vmatprep.mubr.f32.mxu1 %v534_v0  ;;  %437 = vmatprep.mubr.msk.f32.mxu0 %vm537_vm1, %v534_v0  ;;  %p517_p9 = pnand %p516_p8, %p510_p5 }
  0x18   :  { %464 = vperm.xlu1 %462, %v463_v16   ;;  %458 = vperm.xlu0 %456, %v463_v16  }
  0x1a   :  { %414 = vmatmul.mubr.msk.f32.vlgmr.msra.gmra.mxu1 %vm44_vm0, %v422_v6  ;;  %438 = vmatmul.mubr.msk.f32.gmra.mxu0 %vm44_vm0, %v423_v7 }
  0x1b   :  { %207 = vmatprep.mubr.f32.mxu1 %v534_v0  ;;  %440 = vmatprep.mubr.msk.f32.mxu0 %vm537_vm1, %v534_v0 }
  0x1c   :  { %327 = vperm.xlu1 %462, %v38_v18   ;;  %312 = vperm.xlu0 %456, %v38_v18  }
  0x1e   :  { %415 = vmatmul.mubr.msk.f32.gmra.mxu1 %vm44_vm0, %v423_v7  ;;  %441 = vmatmul.mubr.msk.f32.gmra.mxu0 %vm44_vm0, %v32_v12 }
  0x1f   :  { %213 = vmatprep.mubr.f32.mxu1 %v534_v0 }
  0x20   :  { %474 = vset.pattern.permute.xlu1 %v538_v19  ;;  %468 = vset.pattern.permute.xlu0 %v538_v19 }
  0x21   :  { %345 = vperm.xlu1 %474, %v38_v18   ;;  %470 = vperm.xlu0 %468, %v463_v16  }
  0x22   :  { %416 = vmatmul.mubr.msk.f32.gmra.mxu1 %vm44_vm0, %v32_v12 }
  0x25   :  { %475 = vset.pattern.permute.xlu1 %v539_v20  ;;  %481 = vset.pattern.permute.xlu0 %v539_v20 }
  0x26   :  { %477 = vperm.xlu1 %475, %v463_v16   ;;  %363 = vperm.xlu0 %481, %v38_v18  }
  0x2a   :  { %482 = vset.pattern.permute.xlu1 %v540_v21  ;;  %488 = vset.pattern.permute.xlu0 %v540_v21 }
  0x2b   :  { %484 = vperm.xlu1 %482, %v463_v16  }
  0x2f   :  { %381 = vperm.xlu1 %482, %v38_v18  }
  0x93   :  { %v465_v22 = vpop.permute.xlu1 %464  ;;  %v459_v24 = vpop.permute.xlu0 %458 }
  0x94   :  { %v460_v30 = vunpack.i.l.bf16 %v459_v24  ;;  %v466_v34 = vunpack.i.l.bf16 %v465_v22  ;;  %v467_v43 = vunpack.i.h.bf16 %v465_v22  ;;  %v461_v44 = vunpack.i.h.bf16 %v459_v24 }
  0x97   :  { %v328_v23 = vpop.permute.xlu1 %327  ;;  %v313_v26 = vpop.permute.xlu0 %312 }
  0x9c   :  { %v346_v25 = vpop.permute.xlu1 %345  ;;  %v471_v31 = vpop.permute.xlu0 %470 }
  0x9d   :  { %v472_v40 = vunpack.i.l.bf16 %v471_v31  ;;  %v473_v51 = vunpack.i.h.bf16 %v471_v31 }
  0xa1   :  { %v478_v27 = vpop.permute.xlu1 %477  ;;  %v364_v11 = vpop.permute.xlu0 %363 }
  0xa2   :  { %v479_v45 = vunpack.i.l.bf16 %v478_v27  ;;  %v480_v53 = vunpack.i.h.bf16 %v478_v27 }
  0xa6   :  { %v485_v35 = vpop.permute.xlu1 %484 }
  0xa7   :  { %v486_v46 = vunpack.i.l.bf16 %v485_v35  ;;  %v487_v54 = vunpack.i.h.bf16 %v485_v35 }
  0xaa   :  { %v382_v15 = vpop.permute.xlu1 %381 }
  0xd2   :  { %v120_v28 = vpop.f32.mrf.mxu0  ;;  %v126_v29 = vpop.f32.mrf.mxu1 }
  0xd3   :  { %v315_v38 = vmul.f32 %v460_v30, %v120_v28  ;;  %v316_v57 = vmul.f32 %v461_v44, %v126_v29 }
  0xd4   :  { %v122_v32 = vpop.f32.mrf.mxu0  ;;  %v128_v33 = vpop.f32.mrf.mxu1 }
  0xd5   :  { %v330_v39 = vmul.f32 %v466_v34, %v122_v32  ;;  %v331_v50 = vmul.f32 %v467_v43, %v128_v33 }
  0xd6   :  { %v132_v36 = vpop.f32.mrf.mxu1  ;;  %v286_v37 = vpop.f32.mrf.mxu0 }
  0xd7   :  { %v333_v49 = vadd.f32 %v330_v39, %v315_v38  ;;  %v384_v59 = vmul.f32 %v486_v46, %v286_v37  ;;  %v334_v63 = vadd.f32 %v331_v50, %v316_v57  ;;  %v317_v3 = vmul.f32 %v313_v26, %v132_v36 }
  0xd8   :  { %v134_v41 = vpop.f32.mrf.mxu1  ;;  %v436_v42 = vpop.f32.mrf.mxu0 }
  0xd9   :  { %v332_v0 = vmul.f32 %v328_v23, %v134_v41 }
  0xda   :  { %v203_v47 = vpop.f32.mrf.mxu1  ;;  %v291_v48 = vpop.f32.mrf.mxu0 }
  0xdb   :  { %v348_v52 = vmul.f32 %v472_v40, %v203_v47  ;;  %v385_v8 = vmul.f32 %v487_v54, %v291_v48  ;;  %v335_v12 = vadd.f32 %v332_v0, %v317_v3 }
  0xdc   :  { %v205_v55 = vpop.f32.mrf.mxu1  ;;  %v439_v56 = vpop.f32.mrf.mxu0 }
  0xdd   :  { %v351_v58 = vadd.f32 %v348_v52, %v333_v49  ;;  %v366_v60 = vmul.f32 %v479_v45, %v205_v55 }
  0xde   :  { %v209_v61 = vpop.f32.mrf.mxu1  ;;  %v296_v62 = vpop.f32.mrf.mxu0 }
  0xdf   :  { %v369_v1 = vadd.f32 %v366_v60, %v351_v58  ;;  %v349_v2 = vmul.f32 %v473_v51, %v209_v61  ;;  %v386_v20 = vmul.f32 %v382_v15, %v296_v62 }
  0xe0   :  { %v211_v4 = vpop.f32.mrf.mxu1  ;;  %v442_v5 = vpop.f32.mrf.mxu0 }
  0xe1   :  { %v387_v6 = vadd.f32 %v384_v59, %v369_v1  ;;  %v352_v7 = vadd.f32 %v349_v2, %v334_v63  ;;  %v367_v9 = vmul.f32 %v480_v53, %v211_v4 }
  0xe2   :  { %v215_v10 = vpop.f32.mrf.mxu1 }
  0xe3   :  { %391 = vst.msk [vmem:[#allocation5] sm:$0xff] %vm390_vm2, %v387_v6  ;;  %v370_v13 = vadd.f32 %v367_v9, %v352_v7  ;;  %v350_v14 = vmul.f32 %v346_v25, %v215_v10 }
  0xe4   :  { %v217_v16 = vpop.f32.mrf.mxu1 }
  0xe5   :  { %v388_v17 = vadd.f32 %v385_v8, %v370_v13  ;;  %v353_v18 = vadd.f32 %v350_v14, %v335_v12  ;;  %v368_v19 = vmul.f32 %v364_v11, %v217_v16 }
  0xe7   :  { %392 = vst.msk [vmem:[#allocation5 + $0x8] sm:$0xff] %vm390_vm2, %v388_v17  ;;  %v371_v21 = vadd.f32 %v368_v19, %v353_v18 }
  0xe9   :  { %v389_v22 = vadd.f32 %v386_v20, %v371_v21 }
  0xeb   :  { %393 = vst.msk [vmem:[#allocation5 + $0x10] sm:$0xff] %vm390_vm2, %v389_v22 }
  0xec   :  { %520 = shalt.err (!%p517_p9)
}
  0xed   :  { %s542_s25 = smov 128   ;;  %s543_s26 = smov 8  }
  0xee   :  { %405 = dma.vmem_to_hbm [thread:$0]  %s400_s23, 384, %s597_s3, [#allocation4], %s542_s25, %s542_s25, %s543_s26  }
  0xef   :  { %531 = dma.done.wait [#allocation4], 384  }
  0xf0   :  { %532 = vsyncadd [#allocation4], 4294966912 }
  0xf1   :  { %409 = vsyncpa [#allocation3], 1 }
  0xf2   :  { %410 = vsyncpa [#allocation4], 1 }

</bundles_post_ra>
